<compile_context>
chip_gen: v5e
topology: v5e:2x2
jax: 0.10.0
libtpu: 0.0.40
codegen_flags: <defaults>
</compile_context>

<pallas_src>
import jax
import jax.numpy as jnp
from jax import lax
from jax.experimental import pallas as pl
from jax.experimental.pallas import tpu as pltpu


def actor_kernel(x_ref, w1_ref, b1_ref, w2_ref, b2_ref, w3_ref, b3_ref, o_ref):
    cdtype = w1_ref.dtype
    # State tile arrives in native (tile, n_in) layout; cast is a no-op for
    # the f32 path and a cheap VPU cast for the bf16 MXU path.
    x = x_ref[...].astype(cdtype)

    # fc1: (64, n_in) . (tile, n_in)^T -> (64, tile); f32 MXU accumulation.
    # (Contraction on x's last axis == the q @ k.T pattern; no in-kernel
    #  transpose or wrapper-side transposed copy needed.)
    h1 = lax.dot_general(w1_ref[...], x, (((1,), (1,)), ((), ())),
                         preferred_element_type=jnp.float32)
    # Bias + ReLU epilogue in the compute dtype (bf16 on v6e/v7x halves VPU
    # work and intermediate vreg/VMEM traffic; f32 path unchanged).
    h1 = jnp.maximum(h1.astype(cdtype) + b1_ref[...], 0)

    # fc2: (32, 64) @ (64, tile) -> (32, tile)
    h2 = jnp.dot(w2_ref[...], h1, preferred_element_type=jnp.float32)
    h2 = jnp.maximum(h2.astype(cdtype) + b2_ref[...], 0)

    # fc3: (1, 32) @ (32, tile) -> lane-dense (1, tile) slab.
    a = jnp.dot(w3_ref[...], h2, preferred_element_type=jnp.float32)
    o_ref[...] = jnp.tanh(a + b3_ref[...])          # f32 tanh, f32 bias


def _round_up(x, m):
    return ((x + m - 1) // m) * m


def _cdiv(a, b):
    return (a + b - 1) // b


def _choose_tile(B, tile_b):
    """Pick a lane-dense batch tile (multiple of 128) and the grid length."""
    tile = min(_round_up(B, 128), _round_up(max(int(tile_b), 128), 128))
    n = _cdiv(B, tile)
    # v7x has two TensorCores sharing the "parallel" grid axis; an odd number
    # of (multiple) steps leaves one core idle on the last step.  Try one
    # rebalance to an even step count with a smaller tile.
    if n > 1 and n % 2 == 1:
        t2 = _round_up(_cdiv(B, n + 1), 128)
        n2 = _cdiv(B, t2)
        if n2 % 2 == 0:
            tile, n = t2, n2
    return tile, n


def actor_forward(state, params, *, tile_b=2048, compute_dtype=jnp.float32,
                  jax_fallback_below=0):
    """state: (B, n_in) float32 -> action: (B, 1) float32.

    params: (w1, b1, w2, b2, w3, b3) in PyTorch nn.Linear layout
            (w: (out, in), b: (out,)).

    tile_b: batch-lane tile.  2048 is a safe default across v5e/v6e/v7x;
            4096-8192 is reasonable on v6e/v7x for very large batches.
    """
    w1, b1, w2, b2, w3, b3 = params
    B, n_in = state.shape

    # Tiny-batch dispatch (opt-in): XLA's fused tiny GEMMs beat pallas_call
    # fixed overhead for e.g. B <= 128.  Kept off by default so the kernel
    # path is exercised below.
    if B <= jax_fallback_below:
        return actor_reference(state, params)

    tile, num_tiles = _choose_tile(B, tile_b)
    b_pad = tile * num_tiles

    # Pad ONLY the batch axis (no transposed HBM copy); padded rows are zeros
    # and their outputs are sliced off below.
    x = state if b_pad == B else jnp.pad(state, ((0, b_pad - B), (0, 0)))

    cdtype = jnp.dtype(compute_dtype)
    w1c = w1.astype(cdtype)
    w2c = w2.astype(cdtype)
    w3c = w3.astype(cdtype)
    b1c = b1.reshape(-1, 1).astype(cdtype)          # (64, 1)
    b2c = b2.reshape(-1, 1).astype(cdtype)          # (32, 1)
    b3c = b3.reshape(1, 1).astype(jnp.float32)      # (1, 1) stays f32 (tanh)

    def resident(arr):
        # Full-array block + constant index map -> stays VMEM-resident.
        return pl.BlockSpec(arr.shape, lambda i: (0,) * arr.ndim)

    # Per-step VMEM: double-buffered input/output tiles + f32 activation
    # intermediates + weights.  Clamp so large tiles stay inside v7x's VMEM.
    per_lane = (2 * n_in * jnp.dtype(x.dtype).itemsize   # 2x input buffer
                + 2 * 4                                  # 2x f32 output row
                + (64 + 32 + 1) * 4)                     # activations (f32 worst case)
    vmem_est = tile * per_lane + (1 << 20)
    vmem_limit = int(min(max(2 * vmem_est, 16 << 20), 32 << 20))

    out = pl.pallas_call(
        actor_kernel,
        out_shape=jax.ShapeDtypeStruct((1, b_pad), jnp.float32),
        grid=(num_tiles,),
        in_specs=[
            pl.BlockSpec((tile, n_in), lambda i: (i, 0)),   # contiguous state tile
            resident(w1c), resident(b1c),
            resident(w2c), resident(b2c),
            resident(w3c), resident(b3c),
        ],
        out_specs=pl.BlockSpec((1, tile), lambda i: (0, i)),  # lane-dense output
        compiler_params=pltpu.CompilerParams(
            # "parallel" lets v7x's two TCs split the batch axis; no-op on
            # v5e/v6e single-TC parts.
            dimension_semantics=("parallel",),
            vmem_limit_bytes=vmem_limit),
    )(x, w1c, b1c, w2c, b2c, w3c, b3c)

    return out[0, :B].reshape(B, 1)


def init_actor_params(key, n_in):
    """PyTorch nn.Linear default init: U(-1/sqrt(fan_in), 1/sqrt(fan_in)).
    Weights stored in torch layout (out, in); biases (out,)."""
    def linear(key, fan_in, fan_out):
        kw, kb = jax.random.split(key)
        bound = 1.0 / jnp.sqrt(float(fan_in))
        w = jax.random.uniform(kw, (fan_out, fan_in), jnp.float32, -bound, bound)
        b = jax.random.uniform(kb, (fan_out,), jnp.float32, -bound, bound)
        return w, b

    k1, k2, k3 = jax.random.split(key, 3)
    w1, b1 = linear(k1, n_in, 64)
    w2, b2 = linear(k2, 64, 32)
    w3, b3 = linear(k3, 32, 1)
    return (w1, b1, w2, b2, w3, b3)


def actor_reference(state, params):
    """Plain-JAX reference of the PyTorch forward."""
    w1, b1, w2, b2, w3, b3 = params
    h1 = jnp.maximum(state @ w1.T + b1, 0.0)
    h2 = jnp.maximum(h1 @ w2.T + b2, 0.0)
    return jnp.tanh(h2 @ w3.T + b3)


if __name__ == "__main__":
    key = jax.random.PRNGKey(0)
    k_params, k_state1, k_state2 = jax.random.split(key, 3)

    n_in = 16
    params = init_actor_params(k_params, n_in)

    # Case 1: small batch, default exact-f32 path.
    state_small = jax.random.normal(k_state1, (8, n_in), jnp.float32)
    ref_small = actor_reference(state_small, params)
    act_f32 = jax.block_until_ready(actor_forward(state_small, params))
    assert act_f32.shape == (8, 1), act_f32.shape
    assert jnp.allclose(act_f32, ref_small, atol=1e-5, rtol=1e-5), \
        "f32 mismatch vs reference"

    # Case 2: bf16 MXU + bf16 epilogue path (v6e/v7x fast path).
    act_bf16 = jax.block_until_ready(
        actor_forward(state_small, params, compute_dtype=jnp.bfloat16))
    assert jnp.allclose(act_bf16, ref_small, atol=3e-2, rtol=3e-2), \
        "bf16 mismatch vs reference"

    # Case 3: ragged batch with a forced small tile -> multi-step grid
    # (exercises batch padding + the pipelined / parallel batch axis).
    state_big = jax.random.normal(k_state2, (600, n_in), jnp.float32)
    ref_big = actor_reference(state_big, params)
    act_big = jax.block_until_ready(
        actor_forward(state_big, params, tile_b=256))
    assert act_big.shape == (600, 1), act_big.shape
    assert jnp.allclose(act_big, ref_big, atol=1e-5, rtol=1e-5), \
        "tiled f32 mismatch vs reference"

    # Case 4: same batch with the default (large) tile -> single grid step.
    act_big2 = jax.block_until_ready(actor_forward(state_big, params))
    assert jnp.allclose(act_big2, ref_big, atol=1e-5, rtol=1e-5), \
        "large-tile f32 mismatch vs reference"

    print("KERNEL_OK")
</pallas_src>

<mosaic_0001>
module attributes {stable_mosaic.version = 11 : i64} {
  func.func @actor_kernel(%arg0: i32, %arg1: memref<128x16xf32, #tpu.memory_space<vmem>>, %arg2: memref<64x16xf32, #tpu.memory_space<vmem>>, %arg3: memref<64x1xf32, #tpu.memory_space<vmem>>, %arg4: memref<32x64xf32, #tpu.memory_space<vmem>>, %arg5: memref<32x1xf32, #tpu.memory_space<vmem>>, %arg6: memref<1x32xf32, #tpu.memory_space<vmem>>, %arg7: memref<1x1xf32, #tpu.memory_space<vmem>>, %arg8: memref<1x128xf32, #tpu.memory_space<vmem>>) attributes {dimension_semantics = [#tpu.dimension_semantics<parallel>], iteration_bounds = array<i64: 1>, scalar_prefetch = 0 : i64, scratch_operands = 0 : i64, tpu.core_type = #tpu.core_type<tc>, window_params = [{transform_indices = @transform_0, window_bounds = array<i64: 128, 16>}, {pipeline_mode = #tpu.pipeline_mode<synchronous>, transform_indices = @transform_1, window_bounds = array<i64: 64, 16>}, {pipeline_mode = #tpu.pipeline_mode<synchronous>, transform_indices = @transform_2, window_bounds = array<i64: 64, 1>}, {pipeline_mode = #tpu.pipeline_mode<synchronous>, transform_indices = @transform_3, window_bounds = array<i64: 32, 64>}, {pipeline_mode = #tpu.pipeline_mode<synchronous>, transform_indices = @transform_4, window_bounds = array<i64: 32, 1>}, {pipeline_mode = #tpu.pipeline_mode<synchronous>, transform_indices = @transform_5, window_bounds = array<i64: 1, 32>}, {pipeline_mode = #tpu.pipeline_mode<synchronous>, transform_indices = @transform_6, window_bounds = array<i64: 1, 1>}, {transform_indices = @transform_7, window_bounds = array<i64: 1, 128>}]} {
    %c0 = arith.constant 0 : index
    %c0_0 = arith.constant 0 : index
    %0 = vector.load %arg1[%c0, %c0_0] : memref<128x16xf32, #tpu.memory_space<vmem>>, vector<128x16xf32>
    %c0_1 = arith.constant 0 : index
    %c0_2 = arith.constant 0 : index
    %1 = vector.load %arg2[%c0_1, %c0_2] : memref<64x16xf32, #tpu.memory_space<vmem>>, vector<64x16xf32>
    %cst = arith.constant dense<0.000000e+00> : vector<64x128xf32>
    %2 = tpu.matmul %1, %0, %cst {dimension_numbers = #tpu.dot_dimension_numbers<[1], [1], [0], [0], [0, 0, 1, 0], [], []>} : vector<64x16xf32>, vector<128x16xf32>, vector<64x128xf32> -> vector<64x128xf32>
    %c0_3 = arith.constant 0 : index
    %c0_4 = arith.constant 0 : index
    %3 = vector.load %arg3[%c0_3, %c0_4] : memref<64x1xf32, #tpu.memory_space<vmem>>, vector<64x1xf32>
    %4 = vector.broadcast %3 : vector<64x1xf32> to vector<64x128xf32>
    %5 = arith.addf %2, %4 : vector<64x128xf32>
    %cst_5 = arith.constant 0.000000e+00 : f32
    %6 = vector.broadcast %cst_5 : f32 to vector<64x128xf32>
    %7 = arith.maximumf %5, %6 : vector<64x128xf32>
    %c0_6 = arith.constant 0 : index
    %c0_7 = arith.constant 0 : index
    %8 = vector.load %arg4[%c0_6, %c0_7] : memref<32x64xf32, #tpu.memory_space<vmem>>, vector<32x64xf32>
    %cst_8 = arith.constant dense<0.000000e+00> : vector<32x128xf32>
    %9 = tpu.matmul %8, %7, %cst_8 {dimension_numbers = #tpu.dot_dimension_numbers<[1], [0], [0], [1], [0, 0, 1, 1], [], []>} : vector<32x64xf32>, vector<64x128xf32>, vector<32x128xf32> -> vector<32x128xf32>
    %c0_9 = arith.constant 0 : index
    %c0_10 = arith.constant 0 : index
    %10 = vector.load %arg5[%c0_9, %c0_10] : memref<32x1xf32, #tpu.memory_space<vmem>>, vector<32x1xf32>
    %11 = vector.broadcast %10 : vector<32x1xf32> to vector<32x128xf32>
    %12 = arith.addf %9, %11 : vector<32x128xf32>
    %cst_11 = arith.constant 0.000000e+00 : f32
    %13 = vector.broadcast %cst_11 : f32 to vector<32x128xf32>
    %14 = arith.maximumf %12, %13 : vector<32x128xf32>
    %c0_12 = arith.constant 0 : index
    %c0_13 = arith.constant 0 : index
    %15 = vector.load %arg6[%c0_12, %c0_13] : memref<1x32xf32, #tpu.memory_space<vmem>>, vector<1x32xf32>
    %cst_14 = arith.constant dense<0.000000e+00> : vector<1x128xf32>
    %16 = tpu.matmul %15, %14, %cst_14 {dimension_numbers = #tpu.dot_dimension_numbers<[1], [0], [0], [1], [0, 0, 1, 1], [], []>} : vector<1x32xf32>, vector<32x128xf32>, vector<1x128xf32> -> vector<1x128xf32>
    %c0_15 = arith.constant 0 : index
    %c0_16 = arith.constant 0 : index
    %17 = vector.load %arg7[%c0_15, %c0_16] : memref<1x1xf32, #tpu.memory_space<vmem>>, vector<1x1xf32>
    %18 = vector.broadcast %17 : vector<1x1xf32> to vector<1x128xf32>
    %19 = arith.addf %16, %18 : vector<1x128xf32>
    %20 = math.tanh %19 : vector<1x128xf32>
    %c0_17 = arith.constant 0 : index
    %c0_18 = arith.constant 0 : index
    %21 = vector.load %arg8[%c0_17, %c0_18] : memref<1x128xf32, #tpu.memory_space<vmem>>, vector<1x128xf32>
    tpu.vector_store %arg8[%c0_17, %c0_18], %20 {strides = array<i32>} : memref<1x128xf32, #tpu.memory_space<vmem>>, vector<1x128xf32>,
    return
  }
  func.func @transform_0(%arg0: i32) -> (i32, i32) {
    %c0_i32 = arith.constant 0 : i32
    %c0_i32_0 = arith.constant 0 : i32
    return %arg0, %c0_i32 : i32, i32
  }
  func.func @transform_1(%arg0: i32) -> (i32, i32) {
    %c0_i32 = arith.constant 0 : i32
    %c0_i32_0 = arith.constant 0 : i32
    %c0_i32_1 = arith.constant 0 : i32
    return %c0_i32, %c0_i32_0 : i32, i32
  }
  func.func @transform_2(%arg0: i32) -> (i32, i32) {
    %c0_i32 = arith.constant 0 : i32
    %c0_i32_0 = arith.constant 0 : i32
    %c0_i32_1 = arith.constant 0 : i32
    return %c0_i32, %c0_i32_0 : i32, i32
  }
  func.func @transform_3(%arg0: i32) -> (i32, i32) {
    %c0_i32 = arith.constant 0 : i32
    %c0_i32_0 = arith.constant 0 : i32
    %c0_i32_1 = arith.constant 0 : i32
    return %c0_i32, %c0_i32_0 : i32, i32
  }
  func.func @transform_4(%arg0: i32) -> (i32, i32) {
    %c0_i32 = arith.constant 0 : i32
    %c0_i32_0 = arith.constant 0 : i32
    %c0_i32_1 = arith.constant 0 : i32
    return %c0_i32, %c0_i32_0 : i32, i32
  }
  func.func @transform_5(%arg0: i32) -> (i32, i32) {
    %c0_i32 = arith.constant 0 : i32
    %c0_i32_0 = arith.constant 0 : i32
    %c0_i32_1 = arith.constant 0 : i32
    return %c0_i32, %c0_i32_0 : i32, i32
  }
  func.func @transform_6(%arg0: i32) -> (i32, i32) {
    %c0_i32 = arith.constant 0 : i32
    %c0_i32_0 = arith.constant 0 : i32
    %c0_i32_1 = arith.constant 0 : i32
    return %c0_i32, %c0_i32_0 : i32, i32
  }
  func.func @transform_7(%arg0: i32) -> (i32, i32) {
    %c0_i32 = arith.constant 0 : i32
    %c0_i32_0 = arith.constant 0 : i32
    return %c0_i32, %arg0 : i32, i32
  }
}

</mosaic_0001>

<bundles_post_ra>
// kernel: tpu_custom_call.1
= control target key start
LH: loop header
LB: loop body
LE: loop exit
PB: predicated region body
PF: predicated region fallthrough
CT: control target
= control target key end

     0   :  { %s668_s0 = inlined_call_operand.vmem [shape: f32[128,16], index: 0, kind: input, shape index: {}]   ;;  %s669_s1 = inlined_call_operand.vmem [shape: f32[64,16], index: 1, kind: input, shape index: {}]   ;;  %s670_s2 = inlined_call_operand.vmem [shape: f32[64,1], index: 2, kind: input, shape index: {}]   ;;  %s671_s3 = inlined_call_operand.vmem [shape: f32[32,64], index: 3, kind: input, shape index: {}]   ;;  %s672_s4 = inlined_call_operand.vmem [shape: f32[32,1], index: 4, kind: input, shape index: {}]   ;;  %s673_s5 = inlined_call_operand.vmem [shape: f32[1,32], index: 5, kind: input, shape index: {}]   ;;  %s674_s6 = inlined_call_operand.<no memory space> [shape: f32[1,1], index: 6, kind: input, shape index: {}]   ;;  %s675_s7 = inlined_call_operand.hbm [shape: f32[1,128], index: 7, kind: output, shape index: {}]  }
   0x1   :  { %v12_v0 = vstv %s674_s6 }
   0x2   :  { %13 = vst [vmem:[#allocation2] sm:$0x1] %v12_v0 }
   0x3   :  { %v44_v1 = vld [vmem:[%s668_s0 + $0x78] sm:$0xff]  ;;  %vm101_vm0 = vcmask 130048   ;;  %v43_v2 = vld [vmem:[%s668_s0 + $0x70] sm:$0xff] }
   0x4   :  { %376 = vmatpush.xpose.msk.msra.mxu2 %vm101_vm0, %v44_v1  ;;  %377 = vmatpush.xpose.msk.msra.mxu3 %vm101_vm0, %v44_v1 }
   0x5   :  { %347 = vmatpush.xpose.msk.msra.mxu0 %vm101_vm0, %v44_v1 }
   0x6   :  { %14 = vsyncpa [#allocation4], 0  ;;  %v42_v3 = vld [vmem:[%s668_s0 + $0x68] sm:$0xff]  ;;  %v41_v4 = vld [vmem:[%s668_s0 + $0x60] sm:$0xff]  ;;  %v441_v10 = vmov 0   ;;  %vm251_vm1 = vcmask 523264  }
   0x7   :  { %v40_v5 = vld [vmem:[%s668_s0 + $0x58] sm:$0xff]  ;;  %v39_v6 = vld [vmem:[%s668_s0 + $0x50] sm:$0xff]  ;;  %v38_v7 = vld [vmem:[%s668_s0 + $0x48] sm:$0xff]  ;;  %410 = vset.pattern.permute.xlu0 %v441_v10  ;;  %411 = vset.pattern.permute.xlu1 %v441_v10  ;;  %vm305_vm2 = vcmask 261120   ;;  %s442_s6 = smov [#allocation3]   ;;  %s338_s10 = sshll.u32 %s675_s7, 4  ;;  %s339_s10 = int_to_ptr.hbm [resolvable:$true] %s338_s10 }
   0x8   :  { %378 = vmatpush.xpose.msk.msra.mxu2 %vm101_vm0, %v43_v2  ;;  %379 = vmatpush.xpose.msk.msra.mxu3 %vm101_vm0, %v43_v2  ;;  %v37_v8 = vld [vmem:[%s668_s0 + $0x40] sm:$0xff]  ;;  %v36_v9 = vld [vmem:[%s668_s0 + $0x38] sm:$0xff]  ;;  %v35_v12 = vld [vmem:[%s668_s0 + $0x30] sm:$0xff]  ;;  %s336_s30 = sshll.u32 %s442_s6, 4  ;;  %s337_s30 = int_to_ptr.vmem [resolvable:$true] %s336_s30 }
   0x9   :  { %348 = vmatpush.xpose.msk.msra.mxu0 %vm101_vm0, %v43_v2  ;;  %412 = vset.pattern.permute.xlu2 %v441_v10  ;;  %v60_v11 = vld [vmem:[%s670_s2 + $0x38] sm:$0xff]  ;;  %v34_v13 = vld [vmem:[%s668_s0 + $0x28] sm:$0xff]  ;;  %v59_v14 = vld [vmem:[%s670_s2 + $0x30] sm:$0xff] }
   0xa   :  { %98 = vperm.xlu0 %410, %v60_v11   ;;  %v33_v15 = vld [vmem:[%s668_s0 + $0x20] sm:$0xff]  ;;  %v32_v16 = vld [vmem:[%s668_s0 + $0x18] sm:$0xff]  ;;  %v54_v17 = vld [vmem:[%s670_s2 + $0x8] sm:$0xff] }
   0xb   :  { %v58_v18 = vld [vmem:[%s670_s2 + $0x28] sm:$0xff]  ;;  %v31_v19 = vld [vmem:[%s668_s0 + $0x10] sm:$0xff]  ;;  %v57_v21 = vld [vmem:[%s670_s2 + $0x20] sm:$0xff] }
   0xc   :  { %380 = vmatpush.xpose.msk.msra.mxu2 %vm101_vm0, %v42_v3  ;;  %381 = vmatpush.xpose.msk.msra.mxu3 %vm101_vm0, %v42_v3  ;;  %v30_v20 = vld [vmem:[%s668_s0 + $0x8] sm:$0xff]  ;;  %v229_v22 = vld [vmem:[%s672_s4 + $0x10] sm:$0xff]  ;;  %v29_v23 = vld [vmem:[%s668_s0] sm:$0xff] }
   0xd   :  { %349 = vmatpush.xpose.msk.msra.mxu0 %vm101_vm0, %v42_v3  ;;  %88 = vperm.xlu1 %411, %v58_v18   ;;  %v46_v24 = vld [vmem:[%s669_s1 + $0x8] sm:$0xff]  ;;  %v51_v25 = vld [vmem:[%s669_s1 + $0x30] sm:$0xff]  ;;  %v45_v26 = vld [vmem:[%s669_s1] sm:$0xff] }
   0xe   :  { %v53_v27 = vld [vmem:[%s670_s2] sm:$0xff]  ;;  %v56_v29 = vld [vmem:[%s670_s2 + $0x18] sm:$0xff]  ;;  %v47_v30 = vld [vmem:[%s669_s1 + $0x10] sm:$0xff] }
   0xf   :  { %v298_v28 = vld [vmem:[#allocation2] sm:$0x1]  ;;  %78 = vperm.xlu2 %412, %v56_v29   ;;  %v52_v31 = vld [vmem:[%s669_s1 + $0x38] sm:$0xff]  ;;  %v55_v32 = vld [vmem:[%s670_s2 + $0x10] sm:$0xff] }
  0x10   :  { %382 = vmatpush.xpose.msk.msra.mxu2 %vm101_vm0, %v41_v4  ;;  %383 = vmatpush.xpose.msk.msra.mxu3 %vm101_vm0, %v41_v4  ;;  %v228_v33 = vld [vmem:[%s672_s4 + $0x8] sm:$0xff]  ;;  %v48_v34 = vld [vmem:[%s669_s1 + $0x18] sm:$0xff]  ;;  %v49_v36 = vld [vmem:[%s669_s1 + $0x20] sm:$0xff] }
  0x11   :  { %350 = vmatpush.xpose.msk.msra.mxu0 %vm101_vm0, %v41_v4  ;;  %v230_v35 = vld [vmem:[%s672_s4 + $0x18] sm:$0xff]  ;;  %v227_v37 = vld [vmem:[%s672_s4] sm:$0xff]  ;;  %v50_v38 = vld [vmem:[%s669_s1 + $0x28] sm:$0xff] }
  0x12   :  { %93 = vperm.xlu0 %410, %v59_v14   ;;  %v226_v10 = vld [vmem:[%s671_s3 + $0x18] sm:$0xff] }
  0x14   :  { %384 = vmatpush.xpose.msk.msra.mxu2 %vm101_vm0, %v40_v5  ;;  %385 = vmatpush.xpose.msk.msra.mxu3 %vm101_vm0, %v40_v5 }
  0x15   :  { %351 = vmatpush.xpose.msk.msra.mxu0 %vm101_vm0, %v40_v5  ;;  %83 = vperm.xlu1 %411, %v57_v21  }
  0x17   :  { %73 = vperm.xlu2 %412, %v55_v32  }
  0x18   :  { %386 = vmatpush.xpose.msk.msra.mxu2 %vm101_vm0, %v39_v6  ;;  %387 = vmatpush.xpose.msk.msra.mxu3 %vm101_vm0, %v39_v6 }
  0x19   :  { %352 = vmatpush.xpose.msk.msra.mxu0 %vm101_vm0, %v39_v6 }
  0x1a   :  { %68 = vperm.xlu0 %410, %v54_v17  }
  0x1c   :  { %388 = vmatpush.xpose.msk.msra.mxu2 %vm101_vm0, %v38_v7  ;;  %389 = vmatpush.xpose.msk.msra.mxu3 %vm101_vm0, %v38_v7 }
  0x1d   :  { %353 = vmatpush.xpose.msk.msra.mxu0 %vm101_vm0, %v38_v7  ;;  %63 = vperm.xlu1 %411, %v53_v27   ;;  %v223_v7 = vld [vmem:[%s671_s3] sm:$0xff] }
  0x1e   :  { %v297_v27 = vld [vmem:[%s673_s5] sm:$0x1] }
  0x1f   :  { %248 = vperm.xlu2 %412, %v230_v35  }
  0x20   :  { %390 = vmatpush.xpose.msk.msra.mxu2 %vm101_vm0, %v37_v8  ;;  %391 = vmatpush.xpose.msk.msra.mxu3 %vm101_vm0, %v37_v8 }
  0x21   :  { %354 = vmatpush.xpose.msk.msra.mxu0 %vm101_vm0, %v37_v8  ;;  %v224_v8 = vld [vmem:[%s671_s3 + $0x8] sm:$0xff] }
  0x22   :  { %243 = vperm.xlu0 %410, %v229_v22  }
  0x24   :  { %392 = vmatpush.xpose.msk.msra.mxu2 %vm101_vm0, %v36_v9  ;;  %393 = vmatpush.xpose.msk.msra.mxu3 %vm101_vm0, %v36_v9 }
  0x25   :  { %355 = vmatpush.xpose.msk.msra.mxu0 %vm101_vm0, %v36_v9  ;;  %238 = vperm.xlu1 %411, %v228_v33   ;;  %v225_v9 = vld [vmem:[%s671_s3 + $0x10] sm:$0xff] }
  0x27   :  { %233 = vperm.xlu2 %412, %v227_v37  }
  0x28   :  { %394 = vmatpush.xpose.msk.msra.mxu2 %vm101_vm0, %v35_v12  ;;  %395 = vmatpush.xpose.msk.msra.mxu3 %vm101_vm0, %v35_v12 }
  0x29   :  { %356 = vmatpush.xpose.msk.msra.mxu0 %vm101_vm0, %v35_v12 }
  0x2a   :  { %301 = vperm.xlu0 %410, %v298_v28  }
  0x2c   :  { %396 = vmatpush.xpose.msk.msra.mxu2 %vm101_vm0, %v34_v13  ;;  %397 = vmatpush.xpose.msk.msra.mxu3 %vm101_vm0, %v34_v13 }
  0x2d   :  { %357 = vmatpush.xpose.msk.msra.mxu0 %vm101_vm0, %v34_v13 }
  0x30   :  { %398 = vmatpush.xpose.msk.msra.mxu2 %vm101_vm0, %v33_v15  ;;  %399 = vmatpush.xpose.msk.msra.mxu3 %vm101_vm0, %v33_v15 }
  0x31   :  { %358 = vmatpush.xpose.msk.msra.mxu0 %vm101_vm0, %v33_v15 }
  0x34   :  { %400 = vmatpush.xpose.msk.msra.mxu2 %vm101_vm0, %v32_v16  ;;  %401 = vmatpush.xpose.msk.msra.mxu3 %vm101_vm0, %v32_v16 }
  0x35   :  { %359 = vmatpush.xpose.msk.msra.mxu0 %vm101_vm0, %v32_v16 }
  0x38   :  { %402 = vmatpush.xpose.msk.msra.mxu2 %vm101_vm0, %v31_v19  ;;  %403 = vmatpush.xpose.msk.msra.mxu3 %vm101_vm0, %v31_v19 }
  0x39   :  { %360 = vmatpush.xpose.msk.msra.mxu0 %vm101_vm0, %v31_v19 }
  0x3c   :  { %404 = vmatpush.xpose.msk.msra.mxu2 %vm101_vm0, %v30_v20  ;;  %405 = vmatpush.xpose.msk.msra.mxu3 %vm101_vm0, %v30_v20 }
  0x3d   :  { %361 = vmatpush.xpose.msk.msra.mxu0 %vm101_vm0, %v30_v20 }
  0x40   :  { %406 = vmatpush.xpose.msk.msra.mxu2 %vm101_vm0, %v29_v23  ;;  %407 = vmatpush.xpose.msk.msra.mxu3 %vm101_vm0, %v29_v23 }
  0x41   :  { %362 = vmatpush.xpose.msk.msra.mxu0 %vm101_vm0, %v29_v23 }
  0x43   :  { %364 = vmatmul.msk.f32.vlgmr.msra.gmra.mxu2 %vm101_vm0, %v46_v24  ;;  %369 = vmatmul.msk.f32.vlgmr.msra.gmra.mxu3 %vm101_vm0, %v51_v25 }
  0x44   :  { %363 = vmatmul.msk.f32.vlgmr.msra.gmra.mxu0 %vm101_vm0, %v45_v26 }
  0x4b   :  { %365 = vmatmul.msk.f32.gmra.mxu2 %vm101_vm0, %v47_v30  ;;  %370 = vmatmul.msk.f32.gmra.mxu3 %vm101_vm0, %v52_v31 }
  0x53   :  { %366 = vmatmul.msk.f32.gmra.mxu2 %vm101_vm0, %v48_v34 }
  0x5b   :  { %367 = vmatmul.msk.f32.gmra.mxu2 %vm101_vm0, %v49_v36 }
  0x63   :  { %368 = vmatmul.msk.f32.gmra.mxu2 %vm101_vm0, %v50_v38 }
  0x69   :  { %v79_v51 = vpop.permute.xlu2 %78 }
  0x71   :  { %v74_v57 = vpop.permute.xlu2 %73 }
  0x79   :  { %v249_v14 = vpop.permute.xlu2 %248 }
  0x7c   :  { %v99_v39 = vpop.permute.xlu0 %98 }
  0x7f   :  { %v89_v50 = vpop.permute.xlu1 %88 }
  0x81   :  { %v234_v22 = vpop.permute.xlu2 %233 }
  0x84   :  { %v94_v42 = vpop.permute.xlu0 %93 }
  0x87   :  { %v84_v53 = vpop.permute.xlu1 %83 }
  0x8c   :  { %v69_v60 = vpop.permute.xlu0 %68 }
  0x8f   :  { %v64_v2 = vpop.permute.xlu1 %63 }
  0x94   :  { %v244_v15 = vpop.permute.xlu0 %243 }
  0x97   :  { %v239_v19 = vpop.permute.xlu1 %238 }
  0x9c   :  { %v302_v28 = vpop.permute.xlu0 %301 }
  0x9d   :  { %v304_v29 = vperm.slane %v302_v28, 0 }
  0xc1   :  { %v191_v63 = vpop.f32.mrf.mxu0 }
  0xc2   :  { %v192_v4 = vadd.f32 %v191_v63, %v64_v2 }
  0xc4   :  { %v215_v6 = vmax.f32 %v192_v4, 0.0 }
  0xc6   :  { %v194_v40 = vpop.f32.mrf.mxu2  ;;  %v209_v41 = vpop.f32.mrf.mxu3 }
  0xc7   :  { %v210_v43 = vadd.f32 %v209_v41, %v94_v42  ;;  %v195_v0 = vadd.f32 %v194_v40, %v69_v60 }
  0xc9   :  { %v221_v47 = vmax.f32 %v210_v43, 0.0  ;;  %v216_v5 = vmax.f32 %v195_v0, 0.0 }
  0xce   :  { %v197_v44 = vpop.f32.mrf.mxu2  ;;  %v212_v45 = vpop.f32.mrf.mxu3 }
  0xcf   :  { %v213_v46 = vadd.f32 %v212_v45, %v99_v39  ;;  %v198_v61 = vadd.f32 %v197_v44, %v74_v57 }
  0xd1   :  { %v222_v48 = vmax.f32 %v213_v46, 0.0  ;;  %v217_v3 = vmax.f32 %v198_v61, 0.0 }
  0xd3   :  { %272 = vmatpush.msra.mxu1 %v222_v48 }
  0xd5   :  { %273 = vmatpush.msra.mxu1 %v221_v47 }
  0xd6   :  { %v200_v49 = vpop.f32.mrf.mxu2 }
  0xd7   :  { %v201_v58 = vadd.f32 %v200_v49, %v79_v51 }
  0xd9   :  { %v218_v1 = vmax.f32 %v201_v58, 0.0 }
  0xde   :  { %v203_v52 = vpop.f32.mrf.mxu2 }
  0xdf   :  { %v204_v55 = vadd.f32 %v203_v52, %v84_v53 }
  0xe1   :  { %v219_v62 = vmax.f32 %v204_v55, 0.0 }
  0xe6   :  { %v206_v54 = vpop.f32.mrf.mxu2 }
  0xe7   :  { %v207_v56 = vadd.f32 %v206_v54, %v89_v50 }
  0xe9   :  { %v220_v59 = vmax.f32 %v207_v56, 0.0 }
  0xeb   :  { %274 = vmatpush.msra.mxu1 %v220_v59 }
  0xed   :  { %275 = vmatpush.msra.mxu1 %v219_v62 }
  0xef   :  { %276 = vmatpush.msra.mxu1 %v218_v1 }
  0xf1   :  { %277 = vmatpush.msra.mxu1 %v217_v3 }
  0xf3   :  { %278 = vmatpush.msra.mxu1 %v216_v5 }
  0xf5   :  { %279 = vmatpush.msra.mxu1 %v215_v6 }
  0xf6   :  { %371 = vmatmul.msk.f32.vlgmr.msra.gmra.mxu1 %vm251_vm1, %v223_v7 }
  0xfe   :  { %372 = vmatmul.msk.f32.gmra.mxu1 %vm251_vm1, %v224_v8 }
 0x106   :  { %373 = vmatmul.msk.f32.gmra.mxu1 %vm251_vm1, %v225_v9 }
 0x10e   :  { %374 = vmatmul.msk.f32.gmra.mxu1 %vm251_vm1, %v226_v10 }
 0x173   :  { %v281_v11 = vpop.f32.mrf.mxu1 }
 0x174   :  { %v282_v23 = vadd.f32 %v281_v11, %v234_v22 }
 0x176   :  { %v293_v26 = vmax.f32 %v282_v23, 0.0 }
 0x17b   :  { %v284_v12 = vpop.f32.mrf.mxu1 }
 0x17c   :  { %v285_v20 = vadd.f32 %v284_v12, %v239_v19 }
 0x17e   :  { %v294_v25 = vmax.f32 %v285_v20, 0.0 }
 0x183   :  { %v287_v13 = vpop.f32.mrf.mxu1 }
 0x184   :  { %v288_v17 = vadd.f32 %v287_v13, %v244_v15 }
 0x186   :  { %v295_v24 = vmax.f32 %v288_v17, 0.0 }
 0x18b   :  { %v290_v16 = vpop.f32.mrf.mxu1 }
 0x18c   :  { %v291_v18 = vadd.f32 %v290_v16, %v249_v14 }
 0x18e   :  { %v296_v21 = vmax.f32 %v291_v18, 0.0 }
 0x190   :  { %321 = vmatpush.msrb.mxu1 %v296_v21 }
 0x192   :  { %322 = vmatpush.msrb.mxu1 %v295_v24 }
 0x194   :  { %323 = vmatpush.msrb.mxu1 %v294_v25 }
 0x196   :  { %324 = vmatpush.msrb.mxu1 %v293_v26 }
 0x197   :  { %375 = vmatmul.msk.f32.vlgmr.msrb.gmra.mxu1 %vm305_vm2, %v297_v27 }
 0x214   :  { %v326_v30 = vpop.f32.mrf.mxu1 }
 0x215   :  { %v327_v31 = vadd.f32 %v326_v30, %v304_v29 }
 0x217   :  { %413 = vtanh.f32 %v327_v31 }
 0x21d   :  { %v414_v32 = vpop.eup %413 }
 0x21e   :  { %330 = vst [vmem:[#allocation3] sm:$0x1] %v414_v32 }
 0x21f   :  { %341 = dma.vmem_to_hbm [thread:$0]  %s337_s30, 16, %s339_s10, [#allocation4]  }
 0x220   :  { %439 = dma.done.wait [#allocation4], 16  }
 0x221   :  { %440 = vsyncadd [#allocation4], 4294967280 }
 0x222   :  { %346 = vsyncpa [#allocation4], 1 }

</bundles_post_ra>
